<compile_context>
chip_gen: v5e
topology: v5e:2x2
jax: 0.10.0
libtpu: 0.0.40
codegen_flags: <defaults>
</compile_context>

<pallas_src>
import functools

import jax
import jax.numpy as jnp
from jax.experimental import pallas as pl
from jax.experimental.pallas import tpu as pltpu

EPS = 1e-5


# ---------------------------------------------------------------------------
# Fused Pallas kernel
# ---------------------------------------------------------------------------
def _conve_fused_kernel(x_ref, wdense_ref, shift_f_ref, wfc_ref, shift3_ref, e_ref,
                        out_ref, z_ref):
    # Activation pipeline (conv-as-dense-matmul + bn2 + relu + fc + bn3 + relu) runs only
    # on the first grid step; z (B, dim) persists in the VMEM scratch for every N tile.
    @pl.when(pl.program_id(0) == 0)
    def _():
        feat = jnp.dot(x_ref[...], wdense_ref[...],
                       preferred_element_type=jnp.float32)
        feat = jnp.maximum(feat + shift_f_ref[...], 0.0)
        z = jnp.dot(feat, wfc_ref[...], preferred_element_type=jnp.float32)
        z = jnp.maximum(z + shift3_ref[...], 0.0)
        z_ref[...] = z.astype(z_ref.dtype)

    # (B, dim) x (TN, dim)^T on the MXU: bf16 operands, f32 accumulation.  The entity tile
    # is consumed in its natural (N, dim) layout — no transposed copy of the table in HBM.
    out_ref[...] = jax.lax.dot_general(
        z_ref[...], e_ref[...],
        dimension_numbers=(((1,), (1,)), ((), ())),
        preferred_element_type=jnp.float32)


# ---------------------------------------------------------------------------
# ConvE forward: trace-time parameter folding + one fused pallas_call
# ---------------------------------------------------------------------------
def conve_forward(h, r, entity_embed, params, *, reshape_size, kernel_size,
                  tn=512, entity_dtype=jnp.bfloat16):
    """Eval-mode ConvE 1-N scoring.

    tn: entity tile width (lanes of the output).  Per-generation guidance:
        v5e  ~512 f32 / 1024 bf16 (16 MiB default scoped VMEM),
        v6e  2048-4096 bf16 (raise vmem_limit_bytes if needed),
        v7x  re-derive for the 64 MiB VMEM ceiling (prefer bf16 tiles).
    """
    B, dim = h.shape
    s1 = reshape_size
    s2 = dim // reshape_size
    k = kernel_size
    C = params["conv_w"].shape[0]
    H, W = 2 * s1, s2
    Ho, Wo = H - k + 1, W - k + 1
    F = C * Ho * Wo
    N = entity_embed.shape[0]

    # ---- trace-time folding (weight-side only; no per-element runtime cost) -----------
    # bn1 (1 channel):  x_bn = a1 * x + c1
    a1 = params["bn1_g"][0] / jnp.sqrt(params["bn1_v"][0] + EPS)
    c1 = params["bn1_b"][0] - params["bn1_m"][0] * a1
    sbn2 = params["bn2_g"] / jnp.sqrt(params["bn2_v"] + EPS)              # (C,)
    sbn3 = params["bn3_g"] / jnp.sqrt(params["bn3_v"] + EPS)              # (dim,)

    # Conv weight with bn1 input scale and bn2 output scale folded into the columns.
    w_eff = params["conv_w"] * a1 * sbn2[:, None, None, None]             # (C,1,k,k)
    bias_c = params["conv_b"] + c1 * params["conv_w"].sum(axis=(1, 2, 3))  # (C,)
    shift_c = (bias_c - params["bn2_m"]) * sbn2 + params["bn2_b"]          # (C,)
    shift_f = jnp.repeat(shift_c, Ho * Wo).reshape(1, F)   # PyTorch (C,Ho,Wo) flatten order

    # Dense conv operator: W_dense[h*W+w, c*Ho*Wo + ho*Wo + wo] = w_eff[c,0,h-ho,w-wo].
    wk = w_eff[:, 0]                                                       # (C,k,k)
    hh = jnp.arange(H)[:, None, None, None]
    ww = jnp.arange(W)[None, :, None, None]
    ho = jnp.arange(Ho)[None, None, :, None]
    wo = jnp.arange(Wo)[None, None, None, :]
    dy = hh - ho
    dx = ww - wo
    valid = (dy >= 0) & (dy < k) & (dx >= 0) & (dx < k)                    # (H,W,Ho,Wo)
    vals = wk[:, jnp.clip(dy, 0, k - 1), jnp.clip(dx, 0, k - 1)]           # (C,H,W,Ho,Wo)
    w_dense = jnp.where(valid[None], vals, 0.0)
    w_dense = w_dense.transpose(1, 2, 0, 3, 4).reshape(H * W, F)           # (2*dim, F)

    # fc with bn3 scale folded into columns; fc bias folded into the bn3 shift.
    wfc = params["fc_w"].T * sbn3[None, :]                                 # (F, dim)
    shift3 = ((params["fc_b"] - params["bn3_m"]) * sbn3
              + params["bn3_b"]).reshape(1, dim)

    # ---- runtime inputs ----------------------------------------------------------------
    # cat([h,r], dim=2) on (B,1,s1,s2) flattened row-major == concat on the raw vectors.
    x = jnp.concatenate([h, r], axis=1)                                    # (B, 2*dim)

    # Pad N to a multiple of the tile so the output block is 128-lane dense; bf16 stream.
    n_pad = -(-N // tn) * tn
    e_pad = jnp.zeros((n_pad, dim), entity_dtype).at[:N].set(
        entity_embed.astype(entity_dtype))
    grid_n = n_pad // tn

    score_pad = pl.pallas_call(
        _conve_fused_kernel,
        out_shape=jax.ShapeDtypeStruct((B, n_pad), jnp.float32),
        grid_spec=pltpu.PrefetchScalarGridSpec(
            num_scalar_prefetch=0,
            grid=(grid_n,),
            in_specs=[
                pl.BlockSpec((B, 2 * dim), lambda j: (0, 0)),   # x        (resident)
                pl.BlockSpec((2 * dim, F), lambda j: (0, 0)),   # W_dense  (resident)
                pl.BlockSpec((1, F), lambda j: (0, 0)),         # shift_f  (resident)
                pl.BlockSpec((F, dim), lambda j: (0, 0)),       # wfc      (resident)
                pl.BlockSpec((1, dim), lambda j: (0, 0)),       # shift3   (resident)
                pl.BlockSpec((tn, dim), lambda j: (j, 0)),      # E tile   (streamed)
            ],
            out_specs=pl.BlockSpec((B, tn), lambda j: (0, j)),
            scratch_shapes=[pltpu.VMEM((B, dim), entity_dtype)],
        ),
        compiler_params=pltpu.CompilerParams(
            # Must be "arbitrary": the z scratch written on step 0 is reused by every
            # later step, so the steps are not independent across cores.
            dimension_semantics=("arbitrary",),
        ),
    )(x, w_dense, shift_f, wfc, shift3, e_pad)

    return score_pad[:, :N]


# ---------------------------------------------------------------------------
# Pure-JAX reference (eval-mode ConvE) for a correctness sanity check
# ---------------------------------------------------------------------------
def conve_reference(h, r, entity_embed, params, *, reshape_size, kernel_size):
    B, dim = h.shape
    s1 = reshape_size
    s2 = dim // reshape_size
    x = jnp.concatenate([h.reshape(B, 1, s1, s2), r.reshape(B, 1, s1, s2)], axis=2)
    a1 = params["bn1_g"][0] / jnp.sqrt(params["bn1_v"][0] + EPS)
    x = (x - params["bn1_m"][0]) * a1 + params["bn1_b"][0]
    y = jax.lax.conv_general_dilated(
        x, params["conv_w"], (1, 1), "VALID",
        dimension_numbers=("NCHW", "OIHW", "NCHW"))
    y = y + params["conv_b"].reshape(1, -1, 1, 1)
    sbn2 = params["bn2_g"] / jnp.sqrt(params["bn2_v"] + EPS)
    y = (y - params["bn2_m"].reshape(1, -1, 1, 1)) * sbn2.reshape(1, -1, 1, 1) \
        + params["bn2_b"].reshape(1, -1, 1, 1)
    y = jnp.maximum(y, 0.0)
    f = y.reshape(B, -1)
    z = f @ params["fc_w"].T + params["fc_b"]
    sbn3 = params["bn3_g"] / jnp.sqrt(params["bn3_v"] + EPS)
    z = (z - params["bn3_m"]) * sbn3 + params["bn3_b"]
    z = jnp.maximum(z, 0.0)
    return z @ entity_embed.T


# ---------------------------------------------------------------------------
if __name__ == "__main__":
    # ConvE hyperparameters (small, consistent with the module's constraints)
    dim = 32
    reshape_size = 8          # reshape_size1 = 8, reshape_size2 = dim/8 = 4
    n_channel = 4
    kernel_size = 3
    B = 8                     # batch of (h, r) pairs
    n_entities = 300          # > 1 entity tile so the z-scratch reuse path is exercised
    tn = 128                  # entity tile width (lane-dense); see per-gen guidance above

    s1, s2 = reshape_size, dim // reshape_size
    Ho, Wo = 2 * s1 - kernel_size + 1, s2 - kernel_size + 1
    F = n_channel * Ho * Wo   # fc input features

    key = jax.random.PRNGKey(0)
    ks = jax.random.split(key, 19)

    params = {
        "conv_w": 0.1 * jax.random.normal(ks[0], (n_channel, 1, kernel_size, kernel_size), jnp.float32),
        "conv_b": 0.1 * jax.random.normal(ks[1], (n_channel,), jnp.float32),
        "bn1_g": 1.0 + 0.1 * jax.random.normal(ks[2], (1,), jnp.float32),
        "bn1_b": 0.1 * jax.random.normal(ks[3], (1,), jnp.float32),
        "bn1_m": 0.1 * jax.random.normal(ks[4], (1,), jnp.float32),
        "bn1_v": jax.random.uniform(ks[5], (1,), jnp.float32, 0.5, 1.5),
        "bn2_g": 1.0 + 0.1 * jax.random.normal(ks[6], (n_channel,), jnp.float32),
        "bn2_b": 0.1 * jax.random.normal(ks[7], (n_channel,), jnp.float32),
        "bn2_m": 0.1 * jax.random.normal(ks[8], (n_channel,), jnp.float32),
        "bn2_v": jax.random.uniform(ks[9], (n_channel,), jnp.float32, 0.5, 1.5),
        "bn3_g": 1.0 + 0.1 * jax.random.normal(ks[10], (dim,), jnp.float32),
        "bn3_b": 0.1 * jax.random.normal(ks[11], (dim,), jnp.float32),
        "bn3_m": 0.1 * jax.random.normal(ks[12], (dim,), jnp.float32),
        "bn3_v": jax.random.uniform(ks[13], (dim,), jnp.float32, 0.5, 1.5),
        "fc_w": 0.1 * jax.random.normal(ks[14], (dim, F), jnp.float32),
        "fc_b": 0.1 * jax.random.normal(ks[15], (dim,), jnp.float32),
    }

    h = jax.random.normal(ks[16], (B, dim), jnp.float32)
    r = jax.random.normal(ks[17], (B, dim), jnp.float32)
    entity_embed = jax.random.normal(ks[18], (n_entities, dim), jnp.float32)

    fwd = jax.jit(functools.partial(
        conve_forward, reshape_size=reshape_size, kernel_size=kernel_size, tn=tn))
    score = fwd(h, r, entity_embed, params)
    score = jax.block_until_ready(score)

    ref = conve_reference(h, r, entity_embed, params,
                          reshape_size=reshape_size, kernel_size=kernel_size)
    assert score.shape == (B, n_entities)
    # Tolerance accounts for the bf16 entity-table / z stream (f32 MXU accumulation);
    # the activation pipeline and BN folding themselves are computed in f32.
    assert jnp.allclose(score, ref, rtol=5e-2, atol=5e-2), "Pallas ConvE mismatch vs reference"

    print("KERNEL_OK")
</pallas_src>

<mosaic_0001>
module attributes {stable_mosaic.version = 11 : i64} {
  func.func @_conve_fused_kernel(%arg0: i32, %arg1: memref<8x64xf32, #tpu.memory_space<vmem>>, %arg2: memref<64x112xf32, #tpu.memory_space<vmem>>, %arg3: memref<1x112xf32, #tpu.memory_space<vmem>>, %arg4: memref<112x32xf32, #tpu.memory_space<vmem>>, %arg5: memref<1x32xf32, #tpu.memory_space<vmem>>, %arg6: memref<128x32xbf16, #tpu.memory_space<vmem>>, %arg7: memref<8x128xf32, #tpu.memory_space<vmem>>, %arg8: memref<8x32xbf16, #tpu.memory_space<vmem>>) attributes {dimension_semantics = [#tpu.dimension_semantics<arbitrary>], iteration_bounds = array<i64: 3>, scalar_prefetch = 0 : i64, scratch_operands = 1 : i64, tpu.core_type = #tpu.core_type<tc>, window_params = [{pipeline_mode = #tpu.pipeline_mode<synchronous>, transform_indices = @transform_0, window_bounds = array<i64: 8, 64>}, {pipeline_mode = #tpu.pipeline_mode<synchronous>, transform_indices = @transform_1, window_bounds = array<i64: 64, 112>}, {pipeline_mode = #tpu.pipeline_mode<synchronous>, transform_indices = @transform_2, window_bounds = array<i64: 1, 112>}, {pipeline_mode = #tpu.pipeline_mode<synchronous>, transform_indices = @transform_3, window_bounds = array<i64: 112, 32>}, {pipeline_mode = #tpu.pipeline_mode<synchronous>, transform_indices = @transform_4, window_bounds = array<i64: 1, 32>}, {transform_indices = @transform_5, window_bounds = array<i64: 128, 32>}, {transform_indices = @transform_6, window_bounds = array<i64: 8, 128>}]} {
    %c0_i32 = arith.constant 0 : i32
    %0 = arith.cmpi eq, %arg0, %c0_i32 : i32
    %1 = arith.extui %0 : i1 to i32
    %c0_i32_0 = arith.constant 0 : i32
    %2 = arith.cmpi ne, %1, %c0_i32_0 : i32
    scf.if %2 {
      %c0_6 = arith.constant 0 : index
      %c0_7 = arith.constant 0 : index
      %7 = vector.load %arg1[%c0_6, %c0_7] : memref<8x64xf32, #tpu.memory_space<vmem>>, vector<8x64xf32>
      %c0_8 = arith.constant 0 : index
      %c0_9 = arith.constant 0 : index
      %8 = vector.load %arg2[%c0_8, %c0_9] : memref<64x112xf32, #tpu.memory_space<vmem>>, vector<64x112xf32>
      %cst_10 = arith.constant dense<0.000000e+00> : vector<8x112xf32>
      %9 = tpu.matmul %7, %8, %cst_10 {dimension_numbers = #tpu.dot_dimension_numbers<[1], [0], [0], [1], [0, 0, 1, 1], [], []>} : vector<8x64xf32>, vector<64x112xf32>, vector<8x112xf32> -> vector<8x112xf32>
      %c0_11 = arith.constant 0 : index
      %c0_12 = arith.constant 0 : index
      %10 = vector.load %arg3[%c0_11, %c0_12] : memref<1x112xf32, #tpu.memory_space<vmem>>, vector<1x112xf32>
      %11 = vector.broadcast %10 : vector<1x112xf32> to vector<8x112xf32>
      %12 = arith.addf %9, %11 : vector<8x112xf32>
      %cst_13 = arith.constant 0.000000e+00 : f32
      %13 = vector.broadcast %cst_13 : f32 to vector<8x112xf32>
      %14 = arith.maximumf %12, %13 : vector<8x112xf32>
      %c0_14 = arith.constant 0 : index
      %c0_15 = arith.constant 0 : index
      %15 = vector.load %arg4[%c0_14, %c0_15] : memref<112x32xf32, #tpu.memory_space<vmem>>, vector<112x32xf32>
      %cst_16 = arith.constant dense<0.000000e+00> : vector<8x32xf32>
      %16 = tpu.matmul %14, %15, %cst_16 {dimension_numbers = #tpu.dot_dimension_numbers<[1], [0], [0], [1], [0, 0, 1, 1], [], []>} : vector<8x112xf32>, vector<112x32xf32>, vector<8x32xf32> -> vector<8x32xf32>
      %c0_17 = arith.constant 0 : index
      %c0_18 = arith.constant 0 : index
      %17 = vector.load %arg5[%c0_17, %c0_18] : memref<1x32xf32, #tpu.memory_space<vmem>>, vector<1x32xf32>
      %18 = vector.broadcast %17 : vector<1x32xf32> to vector<8x32xf32>
      %19 = arith.addf %16, %18 : vector<8x32xf32>
      %cst_19 = arith.constant 0.000000e+00 : f32
      %20 = vector.broadcast %cst_19 : f32 to vector<8x32xf32>
      %21 = arith.maximumf %19, %20 : vector<8x32xf32>
      %22 = arith.truncf %21 : vector<8x32xf32> to vector<8x32xbf16>
      %c0_20 = arith.constant 0 : index
      %c0_21 = arith.constant 0 : index
      %23 = vector.load %arg8[%c0_20, %c0_21] : memref<8x32xbf16, #tpu.memory_space<vmem>>, vector<8x32xbf16>
      tpu.vector_store %arg8[%c0_20, %c0_21], %22 {strides = array<i32>} : memref<8x32xbf16, #tpu.memory_space<vmem>>, vector<8x32xbf16>,
    } else {
    }
    %c0 = arith.constant 0 : index
    %c0_1 = arith.constant 0 : index
    %3 = vector.load %arg8[%c0, %c0_1] : memref<8x32xbf16, #tpu.memory_space<vmem>>, vector<8x32xbf16>
    %c0_2 = arith.constant 0 : index
    %c0_3 = arith.constant 0 : index
    %4 = vector.load %arg6[%c0_2, %c0_3] : memref<128x32xbf16, #tpu.memory_space<vmem>>, vector<128x32xbf16>
    %cst = arith.constant dense<0.000000e+00> : vector<8x128xf32>
    %5 = tpu.matmul %3, %4, %cst {dimension_numbers = #tpu.dot_dimension_numbers<[1], [1], [0], [0], [0, 0, 1, 0], [], []>} : vector<8x32xbf16>, vector<128x32xbf16>, vector<8x128xf32> -> vector<8x128xf32>
    %c0_4 = arith.constant 0 : index
    %c0_5 = arith.constant 0 : index
    %6 = vector.load %arg7[%c0_4, %c0_5] : memref<8x128xf32, #tpu.memory_space<vmem>>, vector<8x128xf32>
    tpu.vector_store %arg7[%c0_4, %c0_5], %5 {strides = array<i32>} : memref<8x128xf32, #tpu.memory_space<vmem>>, vector<8x128xf32>,
    return
  }
  func.func @transform_0(%arg0: i32) -> (i32, i32) {
    %c0_i32 = arith.constant 0 : i32
    %c0_i32_0 = arith.constant 0 : i32
    %c0_i32_1 = arith.constant 0 : i32
    return %c0_i32, %c0_i32_0 : i32, i32
  }
  func.func @transform_1(%arg0: i32) -> (i32, i32) {
    %c0_i32 = arith.constant 0 : i32
    %c0_i32_0 = arith.constant 0 : i32
    %c0_i32_1 = arith.constant 0 : i32
    return %c0_i32, %c0_i32_0 : i32, i32
  }
  func.func @transform_2(%arg0: i32) -> (i32, i32) {
    %c0_i32 = arith.constant 0 : i32
    %c0_i32_0 = arith.constant 0 : i32
    %c0_i32_1 = arith.constant 0 : i32
    return %c0_i32, %c0_i32_0 : i32, i32
  }
  func.func @transform_3(%arg0: i32) -> (i32, i32) {
    %c0_i32 = arith.constant 0 : i32
    %c0_i32_0 = arith.constant 0 : i32
    %c0_i32_1 = arith.constant 0 : i32
    return %c0_i32, %c0_i32_0 : i32, i32
  }
  func.func @transform_4(%arg0: i32) -> (i32, i32) {
    %c0_i32 = arith.constant 0 : i32
    %c0_i32_0 = arith.constant 0 : i32
    %c0_i32_1 = arith.constant 0 : i32
    return %c0_i32, %c0_i32_0 : i32, i32
  }
  func.func @transform_5(%arg0: i32) -> (i32, i32) {
    %c0_i32 = arith.constant 0 : i32
    %c0_i32_0 = arith.constant 0 : i32
    return %arg0, %c0_i32 : i32, i32
  }
  func.func @transform_6(%arg0: i32) -> (i32, i32) {
    %c0_i32 = arith.constant 0 : i32
    %c0_i32_0 = arith.constant 0 : i32
    return %c0_i32, %arg0 : i32, i32
  }
}

</mosaic_0001>

<bundles_post_ra>
// kernel: conve_forward.1
= control target key start
LH: loop header
LB: loop body
LE: loop exit
PB: predicated region body
PF: predicated region fallthrough
CT: control target
= control target key end

     0   :  { %11 = vsyncpa [#allocation4], 0  ;;  %s899_s0 = inlined_call_operand.vmem [shape: f32[8,64], index: 0, kind: input, shape index: {}]   ;;  %s900_s1 = inlined_call_operand.vmem [shape: f32[64,112], index: 1, kind: input, shape index: {}]   ;;  %s901_s2 = inlined_call_operand.vmem [shape: f32[1,112], index: 2, kind: input, shape index: {}]   ;;  %s902_s3 = inlined_call_operand.vmem [shape: f32[112,32], index: 3, kind: input, shape index: {}]   ;;  %s903_s4 = inlined_call_operand.vmem [shape: f32[1,32], index: 4, kind: input, shape index: {}]   ;;  %s904_s5 = inlined_call_operand.vmem [shape: bf16[384,32], index: 5, kind: input, shape index: {}]   ;;  %s905_s6 = inlined_call_operand.hbm [shape: f32[8,384], index: 6, kind: output, shape index: {}]  }
   0x1   :  { %13 = vsyncpa [#allocation4 + $0x1], 0  ;;  %s709_s21 = smov 0   ;;  %s711_s22 = smov 0  }
   0x2   :  { %s713_s23 = smov 0   ;;  %s715_s24 = smov 0  }
   0x3 LB: > { %s730_s25 = sadd.s32 4294967295, %s672_s24   ;;  %s514_s26 = sadd.s32 4294967294, %s672_s24   ;;  %s672_s24 = sphi %s715_s24, %s911_s24   ;;  %s668_s23 = sphi %s713_s23, %s910_s23   ;;  %s664_s22 = sphi %s711_s22, %s909_s22   ;;  %s660_s21 = sphi %s709_s21, %s908_s21  }
   0x4   : > { %s734_s27 = sadd.s32 1, %s672_s24   ;;  %s157_s28 = sadd.s32 1, %s668_s23 }
   0x5   : > { %s154_s29 = ssub.s32 %s672_s24, %s734_s27  ;;  %p167_p0 = scmp.ne.s32.totalorder %s668_s23, %s664_s22 }
   0x6   : > { %p155_p1 = scmp.eq.s32.totalorder %s154_s29, 0  ;;  %p168_p2 = scmp.eq.s32.totalorder %s730_s25, 2 }
   0x7   : > { %p173_p3 = scmp.ne.s32.totalorder %s664_s22, %s660_s21  ;;  %p174_p4 = scmp.eq.s32.totalorder %s514_s26, 2 }
   0x8   : > { %s745_s30 = scalar_select %p155_p1, %s668_s23, %s157_s28  }
   0x9   : > { %p747_p5 = por %p168_p2, %p167_p0  ;;  %p751_p6 = por %p174_p4, %p173_p3 }
   0xa   : > { %p517_p7 = scmp.ge.s32.totalorder %s672_s24, 1  ;;  %p216_p8 = scmp.lt.s32.totalorder %s672_s24, 4 }
   0xc   : > { %p217_p9 = pnand %p517_p7, %p216_p8 }
   0xd   : > { %s243_s9 = sand.u32 (!%p217_p9), 1, %s664_s22   ;;  %s519_s10 = sshll.u32 (!%p217_p9), %s730_s25, 4 }
   0xe   : > { %220 = sbr.rel (%p217_p9) target bundleno = 502 (0x1f6), region = 44  ;;  %s761_s11 = sshll.u32 (!%p217_p9), %s243_s9, 3 }
   0xf   : > { %p247_p10 = scmp.lt.s32.totalorder (!%p217_p9), %s519_s10, 47  ;;  %s245_s16 = scalar_lea.vmem (!%p217_p9), [#allocation3], %s761_s11 }
  0x10   : > { %p521_p11 = scmp.ne.s32.totalorder (!%p217_p9), %s730_s25, 0 }
  0x13   : > { %s913_s10 = smov (!%p247_p10, %s519_s10), 47  ;;  %255 = sbr.rel (%p521_p11) target bundleno = 303 (0x12f), region = 48 }
  0x14   : > { %s520_s12 = sshll.u32 %s913_s10, 2 }
  0x15   : > { %s766_s15 = scalar_lea.vmem %s904_s5, %s520_s12 }
  0x18   : > { %v264_v0 = vld [vmem:[%s900_s1 + $0x38] sm:$0xff]  ;;  %v263_v1 = vld [vmem:[%s900_s1 + $0x30] sm:$0xff]  ;;  %v262_v2 = vld [vmem:[%s900_s1 + $0x28] sm:$0xff]  ;;  %vm269_vm0 = vcmask 523264   ;;  %vm312_vm1 = vcmask 916480   ;;  %vm338_vm2 = vcmask 257024  }
  0x19   : > { %281 = vmatpush.msra.mxu0 %v264_v0  ;;  %v307_v3 = vld [vmem:[%s902_s3 + $0x68] sm:$0xff]  ;;  %v306_v4 = vld [vmem:[%s902_s3 + $0x60] sm:$0xff]  ;;  %v305_v6 = vld [vmem:[%s902_s3 + $0x58] sm:$0xff] }
  0x1a   : > { %v261_v5 = vld [vmem:[%s900_s1 + $0x20] sm:$0xff]  ;;  %318 = vmatpush.msra.mxu1 %v307_v3  ;;  %v260_v7 = vld [vmem:[%s900_s1 + $0x18] sm:$0xff]  ;;  %v304_v8 = vld [vmem:[%s902_s3 + $0x50] sm:$0xff] }
  0x1b   : > { %282 = vmatpush.msra.mxu0 %v263_v1  ;;  %v259_v9 = vld [vmem:[%s900_s1 + $0x10] sm:$0xff]  ;;  %v303_v10 = vld [vmem:[%s902_s3 + $0x48] sm:$0xff]  ;;  %v302_v12 = vld [vmem:[%s902_s3 + $0x40] sm:$0xff] }
  0x1c   : > { %319 = vmatpush.msra.mxu1 %v306_v4  ;;  %v258_v11 = vld [vmem:[%s900_s1 + $0x8] sm:$0xff]  ;;  %v257_v13 = vld [vmem:[%s900_s1] sm:$0xff]  ;;  %v301_v15 = vld [vmem:[%s902_s3 + $0x38] sm:$0xff] }
  0x1d   : > { %283 = vmatpush.msra.mxu0 %v262_v2  ;;  %v256_v14 = vld [vmem:[%s899_s0] sm:$0xff]  ;;  %v300_v16 = vld [vmem:[%s902_s3 + $0x30] sm:$0xff]  ;;  %v299_v17 = vld [vmem:[%s902_s3 + $0x28] sm:$0xff] }
  0x1e   : > { %320 = vmatpush.msra.mxu1 %v305_v6  ;;  %v298_v18 = vld [vmem:[%s902_s3 + $0x20] sm:$0xff]  ;;  %v297_v19 = vld [vmem:[%s902_s3 + $0x18] sm:$0xff]  ;;  %v296_v20 = vld [vmem:[%s902_s3 + $0x10] sm:$0xff] }
  0x1f   : > { %284 = vmatpush.msra.mxu0 %v261_v5  ;;  %v295_v21 = vld [vmem:[%s902_s3 + $0x8] sm:$0xff]  ;;  %v294_v22 = vld [vmem:[%s902_s3] sm:$0xff] }
  0x20   : > { %321 = vmatpush.msra.mxu1 %v304_v8  ;;  %v608_v23 = vld [vmem:[%s901_s2] ss:$0 sm:$0xff] }
  0x21   : > { %285 = vmatpush.msra.mxu0 %v260_v7  ;;  %v609_v27 = vld [vmem:[%s903_s4] ss:$0 sm:$0xff] }
  0x22   : > { %322 = vmatpush.msra.mxu1 %v303_v10 }
  0x23   : > { %286 = vmatpush.msra.mxu0 %v259_v9 }
  0x24   : > { %323 = vmatpush.msra.mxu1 %v302_v12 }
  0x25   : > { %287 = vmatpush.msra.mxu0 %v258_v11 }
  0x26   : > { %324 = vmatpush.msra.mxu1 %v301_v15 }
  0x27   : > { %288 = vmatpush.msra.mxu0 %v257_v13 }
  0x28   : > { %522 = vmatmul.msk.f32.vlgmr.msra.gmra.mxu0 %vm269_vm0, %v256_v14  ;;  %325 = vmatpush.msra.mxu1 %v300_v16 }
  0x2a   : > { %326 = vmatpush.msra.mxu1 %v299_v17 }
  0x2c   : > { %327 = vmatpush.msra.mxu1 %v298_v18 }
  0x2e   : > { %328 = vmatpush.msra.mxu1 %v297_v19 }
  0x30   : > { %329 = vmatpush.msra.mxu1 %v296_v20 }
  0x32   : > { %330 = vmatpush.msra.mxu1 %v295_v21 }
  0x34   : > { %331 = vmatpush.msra.mxu1 %v294_v22 }
  0xa5   : > { %v290_v24 = vpop.f32.mrf.mxu0 }
  0xa6   : > { %v291_v25 = vadd.f32 %v608_v23, %v290_v24 }
  0xa8   : > { %v293_v26 = vmax.f32 %v291_v25, 0.0 }
  0xaa   : > { %523 = vmatmul.msk.f32.vlgmr.msra.gmra.mxu1 %vm312_vm1, %v293_v26 }
 0x127   : > { %v333_v28 = vpop.f32.mrf.mxu1 }
 0x128   : > { %v334_v29 = vadd.f32 %v609_v27, %v333_v28 }
 0x12a   : > { %v336_v30 = vmax.f32 %v334_v29, 0.0 }
 0x12c   : > { %v337_v31 = vpack.c.bf16 %v336_v30, %v336_v30 }
 0x12e   : > { %339 = vst.msk [vmem:[#allocation2] sm:$0xf] %vm338_vm2, %v337_v31 }
 0x12f PF: > { %v568_v32 = vld [vmem:[%s766_s15 + $0x38] sm:$0xff]  ;;  %vm397_vm3 = vcmask 261120   ;;  %v567_v34 = vld [vmem:[%s766_s15 + $0x30] sm:$0xff]  ;;  %v566_v36 = vld [vmem:[%s766_s15 + $0x28] sm:$0xff]  ;;  %s558_s29 = sshll.u32 %s730_s25, 3  ;;  %s452_s14 = sshll.u32 %s245_s16, 4  ;;  %s453_s14 = int_to_ptr.vmem [resolvable:$true] %s452_s14 }
 0x130   : > { %v423_v33 = vsel %vm397_vm3, %v568_v32, 0  ;;  %v420_v35 = vsel %vm397_vm3, %v567_v34, 0  ;;  %v417_v37 = vsel %vm397_vm3, %v566_v36, 0  ;;  %v565_v38 = vld [vmem:[%s766_s15 + $0x20] sm:$0xff]  ;;  %v564_v40 = vld [vmem:[%s766_s15 + $0x18] sm:$0xff]  ;;  %v563_v42 = vld [vmem:[%s766_s15 + $0x10] sm:$0xff]  ;;  %s450_s13 = scalar_lea.hbm %s905_s6, %s558_s29 }
 0x131   : > { %425 = vmatpush.bf16.xpose.msra.mxu0 %v423_v33  ;;  %v414_v39 = vsel %vm397_vm3, %v565_v38, 0  ;;  %v411_v41 = vsel %vm397_vm3, %v564_v40, 0  ;;  %v408_v43 = vsel %vm397_vm3, %v563_v42, 0  ;;  %v562_v44 = vld [vmem:[%s766_s15 + $0x8] sm:$0xff]  ;;  %v561_v46 = vld [vmem:[%s766_s15] sm:$0xff]  ;;  %s454_s17 = sshll.u32 %s450_s13, 4  ;;  %s455_s17 = int_to_ptr.hbm [resolvable:$true] %s454_s17 }
 0x132   : > { %v405_v45 = vsel %vm397_vm3, %v562_v44, 0  ;;  %v402_v47 = vsel %vm397_vm3, %v561_v46, 0  ;;  %s440_s15 = scalar_lea.sflag [#allocation4], %s243_s9  ;;  %s624_s18 = sshra.s32 %s455_s17, 4  ;;  %s625_s18 = int_to_ptr.hbm [resolvable:$true] %s624_s18 }
 0x133   : > { %s626_s19 = scalar_lea.hbm %s625_s18, 8  ;;  %s630_s26 = scalar_lea.hbm %s905_s6, 24 }
 0x134   : > { %p627_p12 = scmp.ne.s32.totalorder %s625_s18, %s626_s19  ;;  %p631_p1 = scmp.lt.s32.totalorder %s625_s18, %s905_s6 }
 0x135   : > { %v340_v48 = vld [vmem:[#allocation2] sm:$0xf]  ;;  %p632_p2 = scmp.lt.s32.totalorder %s630_s26, %s626_s19 }
 0x136   : > { %p628_p13 = pnand %p627_p12, %p747_p5 }
 0x137   : > { %p633_p3 = por %p632_p2, %p631_p1 }
 0x138   : > { %p629_p0 = pneg %p628_p13 }
 0x139   : > { %426 = vmatpush.bf16.xpose.msra.mxu0 %v420_v35 }
 0x13a   : > { %p634_p4 = pnand %p633_p3, %p629_p0 }
 0x141   : > { %427 = vmatpush.bf16.xpose.msra.mxu0 %v417_v37 }
 0x149   : > { %428 = vmatpush.bf16.xpose.msra.mxu0 %v414_v39 }
 0x151   : > { %429 = vmatpush.bf16.xpose.msra.mxu0 %v411_v41 }
 0x159   : > { %430 = vmatpush.bf16.xpose.msra.mxu0 %v408_v43 }
 0x161   : > { %431 = vmatpush.bf16.xpose.msra.mxu0 %v405_v45 }
 0x169   : > { %432 = vmatpush.bf16.xpose.msra.mxu0 %v402_v47 }
 0x170   : > { %556 = vmatmul.msk.bf16.vlgmr.msra.gmra.mxu0 %vm397_vm3, %v340_v48 }
 0x1ed   : > { %v434_v49 = vpop.f32.mrf.mxu0 }
 0x1ee   : > { %438 = vst [vmem:[%s245_s16] sm:$0xff] %v434_v49 }
 0x1ef   : > { %637 = shalt.err (!%p634_p4)
}
 0x1f0   : > { %569 = dma.vmem_to_hbm [thread:$0]  (%p747_p5), %s453_s14, 128, %s455_s17, %s440_s15  }
 0x1f5   : > { %v436_v50 = vpop.f32.mrf.mxu0 }
 0x1f6 PF: > { %p575_p7 = scmp.ge.s32.totalorder %s672_s24, 2  ;;  %s466_s9 = sand.u32 1, %s660_s21  }
 0x1f7   : > { %s467_s11 = scalar_lea.sflag [#allocation4], %s466_s9 }
 0x1f8   : > { %p572_p8 = pnand %p575_p7, %p751_p6 }
 0x1fa   : > { %p573_p9 = pneg %p572_p8 }
 0x1fc   : > { %655 = dma.done.wait (%p573_p9), %s467_s11, 128  }
 0x1fd   : > { %657 = vsyncadd (%p573_p9), %s467_s11, 4294967168  ;;  %p16_p10 = scmp.ge.s32.totalorder %s734_s27, 5   ;;  %s908_s21 = smov %s664_s22 }
 0x1fe   : > { %s909_s22 = smov %s668_s23  ;;  %s910_s23 = smov %s745_s30 }
 0x1ff   : > { %s911_s24 = smov %s734_s27  ;;  %18 = sbr.rel (!%p16_p10) target bundleno = 3 (0x3), region = 83 }
 0x204   :  { %473 = vsyncpa [#allocation4], 1 }
 0x205   :  { %475 = vsyncpa [#allocation4 + $0x1], 1 }

</bundles_post_ra>
